<compile_context>
chip_gen: v7x
topology: tpu7x:2x2x1
jax: 0.10.0
libtpu: 0.0.40
codegen_flags: <defaults>
</compile_context>

<pallas_src>
import jax
import jax.numpy as jnp
from jax.experimental import pallas as pl
from jax.experimental.pallas import tpu as pltpu


def se_kernel(x_ref, w1_ref, b1_ref, w2_ref, b2_ref, o_ref):
    # x_ref block: (Bt, C, HW)
    x = x_ref[...]

    # Squeeze: global average pool over spatial dims -> (Bt, C) directly,
    # already in the orientation the MLP consumes (no relayout reshape).
    s = jnp.mean(x.astype(jnp.float32), axis=-1)                    # (Bt, C)

    # Excitation MLP as one batched GEMM per block:
    #   Linear(C -> hidden) + ReLU, Linear(hidden -> C) + Sigmoid.
    h = jnp.dot(s, w1_ref[...], preferred_element_type=jnp.float32) + b1_ref[...]
    h = jnp.maximum(h, 0.0)                                         # (Bt, hidden)
    e = jnp.dot(h, w2_ref[...], preferred_element_type=jnp.float32) + b2_ref[...]
    gate = jax.nn.sigmoid(e).astype(x.dtype)                        # (Bt, C)

    # Scale: broadcast the channel gate over spatial positions in input dtype.
    o_ref[...] = x * gate[:, :, None]


def _pick_block_b(B):
    """Largest divisor of B that is <= B//2 (so >=2 parallel blocks for the
    v7x dual-TensorCore megacore); falls back to B itself for B == 1."""
    if B <= 1:
        return max(B, 1)
    for bb in range(B // 2, 0, -1):
        if B % bb == 0:
            return bb
    return 1


def se_block(x, w1, b1, w2, b2):
    """x: (B, C, H, W); w1: (hidden, C); b1: (hidden,); w2: (C, hidden); b2: (C,)."""
    B, C, H, W = x.shape
    HW = H * W
    hidden = w1.shape[0]

    x_flat = x.reshape(B, C, HW)
    # PyTorch Linear computes y = x @ W.T + b; pre-transpose so kernel does x @ W.
    w1t = w1.T                       # (C, hidden)
    w2t = w2.T                       # (hidden, C)
    b1r = b1.reshape(1, hidden)
    b2r = b2.reshape(1, C)

    block_b = _pick_block_b(B)
    grid_b = B // block_b

    # Raise the scoped VMEM limit only if the double-buffered in+out blocks
    # would exceed the smallest default (16 MiB on v5e); cap at 64 MiB (v7x
    # physical VMEM).
    block_bytes = block_b * C * HW * x.dtype.itemsize
    vmem_needed = 4 * block_bytes + 2 * (C * hidden * 4 + hidden * 4 + C * 4)
    cparams = {"dimension_semantics": ("parallel",)}
    if vmem_needed > 16 * 1024 * 1024:
        cparams["vmem_limit_bytes"] = min(vmem_needed + (4 << 20), 64 << 20)

    out = pl.pallas_call(
        se_kernel,
        out_shape=jax.ShapeDtypeStruct((B, C, HW), x.dtype),
        grid_spec=pltpu.PrefetchScalarGridSpec(
            num_scalar_prefetch=0,
            grid=(grid_b,),
            in_specs=[
                pl.BlockSpec((block_b, C, HW), lambda b: (b, 0, 0)),
                pl.BlockSpec((C, hidden), lambda b: (0, 0)),
                pl.BlockSpec((1, hidden), lambda b: (0, 0)),
                pl.BlockSpec((hidden, C), lambda b: (0, 0)),
                pl.BlockSpec((1, C), lambda b: (0, 0)),
            ],
            out_specs=pl.BlockSpec((block_b, C, HW), lambda b: (b, 0, 0)),
        ),
        compiler_params=pltpu.CompilerParams(**cparams),
    )(x_flat, w1t, b1r, w2t, b2r)

    return out.reshape(B, C, H, W)


def se_block_ref(x, w1, b1, w2, b2):
    """Pure-JAX reference matching the PyTorch forward."""
    squeeze = jnp.mean(x, axis=(2, 3))                      # (B, C)
    h = jnp.maximum(squeeze @ w1.T + b1, 0.0)               # (B, hidden)
    e = jax.nn.sigmoid(h @ w2.T + b2)                       # (B, C)
    return x * e[:, :, None, None]


if __name__ == "__main__":
    B, C, H, W = 2, 4, 16, 16
    reduction_ratio = 4
    hidden = C * reduction_ratio

    key = jax.random.PRNGKey(0)
    kx, k1, k2, k3, k4 = jax.random.split(key, 5)

    x = jax.random.normal(kx, (B, C, H, W), dtype=jnp.float32)
    # Deterministic synthetic parameters (PyTorch Linear shapes: (out, in)).
    w1 = jax.random.normal(k1, (hidden, C), dtype=jnp.float32) * 0.1
    b1 = jax.random.normal(k2, (hidden,), dtype=jnp.float32) * 0.1
    w2 = jax.random.normal(k3, (C, hidden), dtype=jnp.float32) * 0.1
    b2 = jax.random.normal(k4, (C,), dtype=jnp.float32) * 0.1

    out = se_block(x, w1, b1, w2, b2)
    out = jax.block_until_ready(out)

    ref = se_block_ref(x, w1, b1, w2, b2)
    assert out.shape == (B, C, H, W)
    assert jnp.allclose(out, ref, atol=1e-5, rtol=1e-5)

    print("KERNEL_OK")
</pallas_src>

<mosaic_0001>
module attributes {stable_mosaic.version = 11 : i64} {
  func.func @se_kernel(%arg0: i32, %arg1: memref<1x4x256xf32, #tpu.memory_space<vmem>>, %arg2: memref<4x16xf32, #tpu.memory_space<vmem>>, %arg3: memref<1x16xf32, #tpu.memory_space<vmem>>, %arg4: memref<16x4xf32, #tpu.memory_space<vmem>>, %arg5: memref<1x4xf32, #tpu.memory_space<vmem>>, %arg6: memref<1x4x256xf32, #tpu.memory_space<vmem>>) attributes {dimension_semantics = [#tpu.dimension_semantics<parallel>], iteration_bounds = array<i64: 2>, scalar_prefetch = 0 : i64, scratch_operands = 0 : i64, tpu.core_type = #tpu.core_type<tc>, window_params = [{transform_indices = @transform_0, window_bounds = array<i64: 1, 4, 256>}, {pipeline_mode = #tpu.pipeline_mode<synchronous>, transform_indices = @transform_1, window_bounds = array<i64: 4, 16>}, {pipeline_mode = #tpu.pipeline_mode<synchronous>, transform_indices = @transform_2, window_bounds = array<i64: 1, 16>}, {pipeline_mode = #tpu.pipeline_mode<synchronous>, transform_indices = @transform_3, window_bounds = array<i64: 16, 4>}, {pipeline_mode = #tpu.pipeline_mode<synchronous>, transform_indices = @transform_4, window_bounds = array<i64: 1, 4>}, {transform_indices = @transform_5, window_bounds = array<i64: 1, 4, 256>}]} {
    %c0 = arith.constant 0 : index
    %c0_0 = arith.constant 0 : index
    %c0_1 = arith.constant 0 : index
    %0 = vector.load %arg1[%c0, %c0_0, %c0_1] : memref<1x4x256xf32, #tpu.memory_space<vmem>>, vector<1x4x256xf32>
    %cst = arith.constant dense<0.000000e+00> : vector<1x4xf32>
    %1 = vector.multi_reduction <add>, %0, %cst [2] : vector<1x4x256xf32> to vector<1x4xf32>
    %cst_2 = arith.constant 2.560000e+02 : f32
    %2 = vector.broadcast %cst_2 : f32 to vector<1x4xf32>
    %3 = arith.divf %1, %2 : vector<1x4xf32>
    %c0_3 = arith.constant 0 : index
    %c0_4 = arith.constant 0 : index
    %4 = vector.load %arg2[%c0_3, %c0_4] : memref<4x16xf32, #tpu.memory_space<vmem>>, vector<4x16xf32>
    %cst_5 = arith.constant dense<0.000000e+00> : vector<1x16xf32>
    %5 = tpu.matmul %3, %4, %cst_5 {dimension_numbers = #tpu.dot_dimension_numbers<[1], [0], [0], [1], [0, 0, 1, 1], [], []>} : vector<1x4xf32>, vector<4x16xf32>, vector<1x16xf32> -> vector<1x16xf32>
    %c0_6 = arith.constant 0 : index
    %c0_7 = arith.constant 0 : index
    %6 = vector.load %arg3[%c0_6, %c0_7] : memref<1x16xf32, #tpu.memory_space<vmem>>, vector<1x16xf32>
    %7 = arith.addf %5, %6 : vector<1x16xf32>
    %cst_8 = arith.constant 0.000000e+00 : f32
    %8 = vector.broadcast %cst_8 : f32 to vector<1x16xf32>
    %9 = arith.maximumf %7, %8 : vector<1x16xf32>
    %c0_9 = arith.constant 0 : index
    %c0_10 = arith.constant 0 : index
    %10 = vector.load %arg4[%c0_9, %c0_10] : memref<16x4xf32, #tpu.memory_space<vmem>>, vector<16x4xf32>
    %cst_11 = arith.constant dense<0.000000e+00> : vector<1x4xf32>
    %11 = tpu.matmul %9, %10, %cst_11 {dimension_numbers = #tpu.dot_dimension_numbers<[1], [0], [0], [1], [0, 0, 1, 1], [], []>} : vector<1x16xf32>, vector<16x4xf32>, vector<1x4xf32> -> vector<1x4xf32>
    %c0_12 = arith.constant 0 : index
    %c0_13 = arith.constant 0 : index
    %12 = vector.load %arg5[%c0_12, %c0_13] : memref<1x4xf32, #tpu.memory_space<vmem>>, vector<1x4xf32>
    %13 = arith.addf %11, %12 : vector<1x4xf32>
    %14 = arith.negf %13 : vector<1x4xf32>
    %15 = math.exp %14 : vector<1x4xf32>
    %cst_14 = arith.constant 1.000000e+00 : f32
    %16 = vector.broadcast %cst_14 : f32 to vector<1x4xf32>
    %17 = arith.addf %16, %15 : vector<1x4xf32>
    %18 = arith.divf %16, %17 : vector<1x4xf32>
    %19 = vector.shape_cast %18 : vector<1x4xf32> to vector<1x4x1xf32>
    %20 = vector.broadcast %19 : vector<1x4x1xf32> to vector<1x4x256xf32>
    %21 = arith.mulf %0, %20 : vector<1x4x256xf32>
    %c0_15 = arith.constant 0 : index
    %c0_16 = arith.constant 0 : index
    %c0_17 = arith.constant 0 : index
    %22 = vector.load %arg6[%c0_15, %c0_16, %c0_17] : memref<1x4x256xf32, #tpu.memory_space<vmem>>, vector<1x4x256xf32>
    tpu.vector_store %arg6[%c0_15, %c0_16, %c0_17], %21 {strides = array<i32>} : memref<1x4x256xf32, #tpu.memory_space<vmem>>, vector<1x4x256xf32>,
    return
  }
  func.func @transform_0(%arg0: i32) -> (i32, i32, i32) {
    %c0_i32 = arith.constant 0 : i32
    %c0_i32_0 = arith.constant 0 : i32
    %c0_i32_1 = arith.constant 0 : i32
    return %arg0, %c0_i32, %c0_i32_0 : i32, i32, i32
  }
  func.func @transform_1(%arg0: i32) -> (i32, i32) {
    %c0_i32 = arith.constant 0 : i32
    %c0_i32_0 = arith.constant 0 : i32
    %c0_i32_1 = arith.constant 0 : i32
    return %c0_i32, %c0_i32_0 : i32, i32
  }
  func.func @transform_2(%arg0: i32) -> (i32, i32) {
    %c0_i32 = arith.constant 0 : i32
    %c0_i32_0 = arith.constant 0 : i32
    %c0_i32_1 = arith.constant 0 : i32
    return %c0_i32, %c0_i32_0 : i32, i32
  }
  func.func @transform_3(%arg0: i32) -> (i32, i32) {
    %c0_i32 = arith.constant 0 : i32
    %c0_i32_0 = arith.constant 0 : i32
    %c0_i32_1 = arith.constant 0 : i32
    return %c0_i32, %c0_i32_0 : i32, i32
  }
  func.func @transform_4(%arg0: i32) -> (i32, i32) {
    %c0_i32 = arith.constant 0 : i32
    %c0_i32_0 = arith.constant 0 : i32
    %c0_i32_1 = arith.constant 0 : i32
    return %c0_i32, %c0_i32_0 : i32, i32
  }
  func.func @transform_5(%arg0: i32) -> (i32, i32, i32) {
    %c0_i32 = arith.constant 0 : i32
    %c0_i32_0 = arith.constant 0 : i32
    %c0_i32_1 = arith.constant 0 : i32
    return %arg0, %c0_i32, %c0_i32_0 : i32, i32, i32
  }
}

</mosaic_0001>

<bundles_post_ra>
// kernel: tpu_custom_call.1
= control target key start
LH: loop header
LB: loop body
LE: loop exit
PB: predicated region body
PF: predicated region fallthrough
CT: control target
= control target key end

     0   :  { %10 = vsyncpa [#allocation3], 0  ;;  %s796_s0 = inlined_call_operand.vmem [shape: f32[2,4,256], index: 0, kind: input, shape index: {}]   ;;  %s797_s1 = inlined_call_operand.vmem [shape: f32[4,16], index: 1, kind: input, shape index: {}]   ;;  %s798_s2 = inlined_call_operand.vmem [shape: f32[1,16], index: 2, kind: input, shape index: {}]   ;;  %s799_s3 = inlined_call_operand.vmem [shape: f32[16,4], index: 3, kind: input, shape index: {}]   ;;  %s800_s4 = inlined_call_operand.vmem [shape: f32[1,4], index: 4, kind: input, shape index: {}]   ;;  %s801_s5 = inlined_call_operand.hbm [shape: f32[2,4,256], index: 5, kind: output, shape index: {}]  }
   0x1   :  { %12 = vsyncpa [#allocation3 + $0x1], 0  ;;  %s681_s18 = smov 0   ;;  %s683_s19 = smov 0  }
   0x2   :  { %s685_s20 = smov 0   ;;  %s687_s21 = smov 0  }
   0x3 LB: > { %s702_s22 = sadd.s32 4294967295, %s644_s21   ;;  %s496_s23 = sadd.s32 4294967294, %s644_s21   ;;  %s644_s21 = sphi %s687_s21, %s807_s21   ;;  %s640_s20 = sphi %s685_s20, %s806_s20   ;;  %s636_s19 = sphi %s683_s19, %s805_s19   ;;  %s632_s18 = sphi %s681_s18, %s804_s18  }
   0x4   : > { %s706_s24 = sadd.s32 1, %s644_s21   ;;  %s135_s25 = sadd.s32 1, %s640_s20 }
   0x5   : > { %s132_s26 = ssub.s32 %s644_s21, %s706_s24  ;;  %p145_p0 = scmp.ne.s32.totalorder %s640_s20, %s636_s19 }
   0x6   : > { %p133_p1 = scmp.eq.s32.totalorder %s132_s26, 0  ;;  %p146_p2 = scmp.eq.s32.totalorder %s702_s22, 1 }
   0x7   : > { %p151_p3 = scmp.ne.s32.totalorder %s636_s19, %s632_s18  ;;  %p152_p4 = scmp.eq.s32.totalorder %s496_s23, 1 }
   0x8   : > { %s717_s27 = scalar_select %p133_p1, %s640_s20, %s135_s25  }
   0x9   : > { %p719_p5 = por %p146_p2, %p145_p0  ;;  %p723_p6 = por %p152_p4, %p151_p3 }
   0xa   : > { %p499_p7 = scmp.ge.s32.totalorder %s644_s21, 1  ;;  %p190_p8 = scmp.lt.s32.totalorder %s644_s21, 3 }
   0xc   : > { %p191_p9 = pnand %p499_p7, %p190_p8 }
   0xd   : > { %p218_p10 = scmp.lt.s32.totalorder (!%p191_p9), %s702_s22, 1  ;;  %vm227_vm0 = vcmask (!%p191_p9), 1043456   ;;  %v646_v5 = vmov (!%p191_p9), 0.0   ;;  %v235_v6 = vld [vmem:[%s797_s1] sm:$0xf] (!%p191_p9)  ;;  %vm647_vm1 = vmmov (!%p191_p9), 0   ;;  %v238_v7 = vlaneseq (!%p191_p9) }
   0xe   : > { %194 = sbr.rel (%p191_p9) target bundleno = 768 (0x300), region = 40  ;;  %519 = vmatprep.subr.mxu0 (!%p191_p9), %v646_v5  ;;  %521 = vmatprep.mubr.msk.f32.mxu0 (!%p191_p9), %vm647_vm1, %v646_v5  ;;  %vm244_vm2 = vcmask (!%p191_p9), 31744   ;;  %v321_v14 = vld [vmem:[%s799_s3] sm:$0xff] (!%p191_p9)  ;;  %v322_v15 = vld [vmem:[%s799_s3 + $0x8] sm:$0xff] (!%p191_p9)  ;;  %v648_v17 = vmov (!%p191_p9), 0.0|0.0   ;;  %vm324_vm3 = vcmask (!%p191_p9), 130048  }
   0xf   : > { %520 = vmatpush3.msk.msra.mxu0 (!%p191_p9), %vm227_vm0, %v235_v6  ;;  %528 = vmatprep.mubr.msk.f32.mxu1 (!%p191_p9), %vm647_vm1, %v646_v5  ;;  %v239_v8 = vand.u32 (!%p191_p9), 127, %v238_v7  ;;  %v241_v9 = vshrl.u32 (!%p191_p9), %v238_v7, 7  ;;  %v532_v16 = vpack.c.bf16 (!%p191_p9), %v322_v15, %v321_v14  ;;  %v236_v18 = vld [vmem:[%s798_s2] sm:$0x1] (!%p191_p9)  ;;  %v649_v33 = vmov (!%p191_p9), 839922192  }
  0x10   : > { %531 = vmatprep.subr.bf16.mxu1 (!%p191_p9), %v648_v17  ;;  %v323_v23 = vld [vmem:[%s800_s4] sm:$0x1] (!%p191_p9)  ;;  %v413_v34 = vunpack.c.l.s4 (!%p191_p9), %v649_v33  ;;  %s215_s26 = sand.u32 (!%p191_p9), 1, %s636_s19  }
  0x11   : > { %v242_v10 = vsub.s32 (!%p191_p9), %v239_v8, %v241_v9  ;;  %533 = vmatpush3.bf16.msra.mxu1 (!%p191_p9), %v532_v16  ;;  %v406_v30 = vsub.s32 (!%p191_p9), 0, %v241_v9  ;;  %s423_s12 = scalar_lea.sflag (!%p191_p9), [#allocation3], %s215_s26 }
  0x12   : > { %v414_v35 = vunpack.c.0.s8 (!%p191_p9), %v413_v34 }
  0x14   : > { %v417_v36 = vsub.s32 (!%p191_p9), %v414_v35, %v241_v9 }
  0x15   : > { %s219_s30 = scalar_select %p218_p10, %s702_s22, 1 }
  0x17   : > { %s512_s6 = sshll.u32 %s219_s30, 3  ;;  %s500_s30 = sshll.u32 %s215_s26, 3 }
  0x18   : > { %s222_s9 = scalar_lea.vmem %s796_s0, %s512_s6  ;;  %s513_s6 = sshll.u32 %s702_s22, 7 }
  0x19   : > { %v223_v0 = vld [vmem:[%s222_s9] sm:$0xff]  ;;  %s217_s7 = scalar_lea.vmem [#allocation2], %s500_s30  ;;  %s754_s11 = scalar_lea.hbm %s801_s5, %s513_s6 }
  0x1a   : > { %v225_v1 = vcombine.high %v223_v0, %v223_v0  ;;  %v228_v2 = vsel %vm227_vm0, %v223_v0, 0.0  ;;  %s437_s8 = sshll.u32 %s217_s7, 4  ;;  %s650_s22 = smov [#allocation2]   ;;  %s756_s8 = int_to_ptr.vmem [resolvable:$true] %s437_s8 }
  0x1b   : > { %s582_s13 = scalar_lea.vmem %s756_s8, 128  ;;  %s586_s14 = sshll.u32 %s650_s22, 4  ;;  %s587_s14 = int_to_ptr.vmem [resolvable:$false] %s586_s14 }
  0x1c   : > { %v229_v3 = vsel %vm227_vm0, %v225_v1, 0.0  ;;  %p583_p11 = scmp.ne.s32.totalorder %s756_s8, %s582_s13  ;;  %s588_s15 = scalar_lea.vmem %s587_s14, 256 }
  0x1d   : > { %v230_v4 = vadd.f32 %v229_v3, %v228_v2  ;;  %p589_p0 = scmp.lt.s32.totalorder %s756_s8, %s587_s14  ;;  %p590_p1 = scmp.lt.s32.totalorder %s588_s15, %s582_s13 }
  0x1e   : > { %p584_p12 = pnand %p583_p11, %p719_p5 }
  0x1f   : > { %231 = vadd.xlane.f32.xlu0 %v230_v4  ;;  %p591_p2 = por %p590_p1, %p589_p0 }
  0x20   : > { %p585_p13 = pneg %p584_p12 }
  0x22   : > { %p592_p3 = pnand %p591_p2, %p585_p13 }
  0xac   : > { %v232_v11 = vpop.xlane.xlu0 %231 }
  0xad   : > { %v234_v12 = vmul.f32 0.00390625, %v232_v11 }
  0xaf   : > { %v243_v13 = vrot.slane %v234_v12, %v242_v10 }
  0xb1   : > { %522 = vmatmul.mubr.msk.f32.vlgmr.msra.gmra.mrb[0].mxu0 %vm244_vm2, %v243_v13 }
 0x184   : > { %v316_v19 = vpop.f32.mrb[0].mxu0 }
 0x185   : > { %v317_v20 = vadd.f32 %v316_v19, %v236_v18  ;;  %v523_v21 = vpop.f32.mrb[1].mxu0 }
 0x187   : > { %v320_v22 = vmax.f32 %v317_v20, 0.0 }
 0x189   : > { %529 = vmatmul.mubr.msk.f32.vlgmr.msra.gmra.mrb[0].mxu1 %vm324_vm3, %v320_v22 }
 0x25c   : > { %v394_v24 = vpop.f32.mrb[0].mxu1 }
 0x25d   : > { %v395_v25 = vadd.f32 %v394_v24, %v323_v23  ;;  %v530_v26 = vpop.f32.mrb[1].mxu1 }
 0x25f   : > { %v506_v27 = vmul.f32 -1.442695, %v395_v25 }
 0x261   : > { %578 = vpow2.f32 %v506_v27 }
 0x26b   : > { %v579_v28 = vpop.eup %578 }
 0x26c   : > { %v401_v29 = vadd.f32 1.0, %v579_v28 }
 0x26e   : > { %580 = vrcp.f32 %v401_v29 }
 0x278   : > { %v581_v31 = vpop.eup %580 }
 0x279   : > { %v407_v32 = vrot.slane %v581_v31, %v406_v30 }
 0x27b   : > { %409 = vbcast.lane.b32.xlu0 %v407_v32, 256 }
 0x2ed   : > { %v410_v37 = vpop.permute.xlu0 %409 }
 0x2ee   : > { %v418_v38 = vrot.slane %v410_v37, %v417_v36 }
 0x2f0   : > { %v420_v39 = vmul.f32 %v418_v38, %v223_v0 }
 0x2f2   : > { %421 = vst [vmem:[%s217_s7] sm:$0xff] %v420_v39 }
 0x2f3   : > { %595 = shalt.err (!%p592_p3)
}
 0x2f4   : > { %s596_s16 = scalar_lea.hbm %s754_s11, 128  ;;  %s600_s25 = scalar_lea.hbm %s801_s5, 256 }
 0x2f5   : > { %p597_p4 = scmp.ne.s32.totalorder %s754_s11, %s596_s16  ;;  %p601_p9 = scmp.lt.u32.totalorder %s754_s11, %s801_s5 }
 0x2f6   : > { %p602_p10 = scmp.lt.u32.totalorder %s600_s25, %s596_s16  ;;  %p604_p12 = scmp.lt.u32.totalorder %s596_s16, %s754_s11 }
 0x2f7   : > { %p598_p7 = pnand %p597_p4, %p719_p5 }
 0x2f8   : > { %p603_p11 = por %p602_p10, %p601_p9 }
 0x2f9   : > { %p599_p8 = pneg %p598_p7 }
 0x2fa   : > { %p605_p13 = por %p604_p12, %p603_p11 }
 0x2fc   : > { %p606_p0 = pnand %p605_p13, %p599_p8 }
 0x2fe   : > { %609 = shalt.err (!%p606_p0)
}
 0x2ff   : > { %534 = dma.vmem_to_hbm [thread:$0]  (%p719_p5), %s756_s8, 128, %s754_s11, %s423_s12  }
 0x300 PF: > { %p540_p1 = scmp.ge.s32.totalorder %s644_s21, 2  ;;  %s449_s6 = sand.u32 1, %s632_s18  }
 0x301   : > { %s450_s7 = scalar_lea.sflag [#allocation3], %s449_s6 }
 0x302   : > { %p537_p2 = pnand %p540_p1, %p723_p6 }
 0x304   : > { %627 = dma.done.wait (!%p537_p2), %s450_s7, 128  }
 0x305   : > { %629 = vsyncadd (!%p537_p2), %s450_s7, 4294967168  ;;  %p15_p3 = scmp.ge.s32.totalorder %s706_s24, 4   ;;  %s804_s18 = smov %s636_s19 }
 0x306   : > { %s805_s19 = smov %s640_s20  ;;  %s806_s20 = smov %s717_s27 }
 0x307   : > { %s807_s21 = smov %s706_s24  ;;  %17 = sbr.rel (!%p15_p3) target bundleno = 3 (0x3), region = 75 }
 0x30e   :  { %455 = vsyncpa [#allocation3], 1 }
 0x30f   :  { %457 = vsyncpa [#allocation3 + $0x1], 1 }

</bundles_post_ra>
